<compile_context>
chip_gen: v7x
topology: tpu7x:2x2x1
jax: 0.10.0
libtpu: 0.0.40
codegen_flags: <defaults>
</compile_context>

<pallas_src>
import jax
import jax.numpy as jnp
from jax import lax
from jax.experimental import pallas as pl
from jax.experimental.pallas import tpu as pltpu


LANES = 128                   # vreg lane width (last dim of every block)
ACC_ROWS = 8                  # vreg sublane height -> accumulator block (8, 128)
MIN_BLOCK_ROWS = 32           # legal sublane multiple for f32/bf16/int8 blocks
CHUNK_ROWS = 256              # in-kernel accumulation chunk (bounds VMEM temps)
NUM_SHARDS = 2                # leading "parallel" axis -> both TensorCores on v7x
TARGET_BLOCK_BYTES = 4 << 20  # ~4 MiB per input per grid step (v6e/v7x sweet spot)
VMEM_LIMIT_BYTES = 48 << 20   # 2 inputs x 2 buffers x 4 MiB << 48 MiB (< v7x 64 MiB)
SMALL_N_THRESHOLD = 1 << 18   # below this, XLA's fused reduction is already at roofline


def _cdiv(a, b):
    return -(-a // b)


def _make_sq_err_kernel(*, block_rows, chunk_rows, blocks_per_shard,
                        valid_rows, needs_mask):
    """Build the kernel accumulating sum((pred - tgt)^2) into an (8,128) block.

    Grid = (num_shards, blocks_per_shard).  The output block index depends only
    on the shard axis, so the (8, 128) block stays resident in VMEM and acts as
    the per-shard accumulator across the inner (reduction) axis.  Per-chunk
    reduction is pure VPU (elementwise + reshape-grouped adds); the final
    cross-lane reduce of the small partials happens once in the JAX wrapper.
    """
    num_chunks = block_rows // chunk_rows

    def kernel(pred_ref, tgt_ref, acc_ref):
        shard = pl.program_id(0)
        blk = pl.program_id(1)

        @pl.when(blk == 0)
        def _():
            acc_ref[...] = jnp.zeros_like(acc_ref)

        # Logical block index.  For a ragged shard split it can exceed the
        # physical block count (the index_map clamps the DMA); its contribution
        # is then fully masked below, so nothing is double counted.
        logical_blk = shard * blocks_per_shard + blk
        row0 = logical_blk * block_rows

        if needs_mask:
            # Hoisted out of the loop: JAX does not CSE broadcast_in_dim.
            row_iota = lax.broadcasted_iota(jnp.int32, (chunk_rows, LANES), 0)

        def body(j, carry):
            start = pl.multiple_of(j * chunk_rows, chunk_rows)
            p = pred_ref[pl.ds(start, chunk_rows), :].astype(jnp.float32)
            t = tgt_ref[pl.ds(start, chunk_rows), :].astype(jnp.float32)
            d = p - t
            if needs_mask:
                rows_here = row0 + start + row_iota
                d = jnp.where(rows_here < valid_rows, d, 0.0)
            # VPU-only reduction down to one vreg-shaped (8, 128) partial.
            part = jnp.sum((d * d).reshape(-1, ACC_ROWS, LANES), axis=0)
            return carry + part

        carry0 = jnp.zeros((ACC_ROWS, LANES), jnp.float32)
        acc_ref[...] += lax.fori_loop(0, num_chunks, body, carry0)

    return kernel


def _pallas_sq_err_partials(p2d, t2d, *, block_rows, chunk_rows, num_shards,
                            blocks_per_shard, total_blocks, needs_mask):
    rows, lanes = p2d.shape
    assert lanes == LANES

    kernel = _make_sq_err_kernel(
        block_rows=block_rows, chunk_rows=chunk_rows,
        blocks_per_shard=blocks_per_shard, valid_rows=rows,
        needs_mask=needs_mask)

    def in_map(c, i):
        # Clamp so a ragged shard split never requests a fully out-of-bounds
        # block; the duplicated fetch is masked to zero inside the kernel.
        return (jnp.minimum(c * blocks_per_shard + i, total_blocks - 1), 0)

    grid_spec = pltpu.PrefetchScalarGridSpec(
        num_scalar_prefetch=0,
        grid=(num_shards, blocks_per_shard),
        in_specs=[
            pl.BlockSpec((block_rows, LANES), in_map),
            pl.BlockSpec((block_rows, LANES), in_map),
        ],
        out_specs=pl.BlockSpec((ACC_ROWS, LANES), lambda c, i: (c, 0)),
    )

    in_bytes = rows * LANES * (p2d.dtype.itemsize + t2d.dtype.itemsize)
    out_bytes = num_shards * ACC_ROWS * LANES * 4
    cost = pl.CostEstimate(flops=3 * rows * LANES, transcendentals=0,
                           bytes_accessed=in_bytes + out_bytes)

    return pl.pallas_call(
        kernel,
        out_shape=jax.ShapeDtypeStruct((num_shards * ACC_ROWS, LANES),
                                       jnp.float32),
        grid_spec=grid_spec,
        compiler_params=pltpu.CompilerParams(
            dimension_semantics=("parallel", "arbitrary"),
            vmem_limit_bytes=VMEM_LIMIT_BYTES,
        ),
        cost_estimate=cost,
    )(p2d, t2d)


class BaseLossPallas:
    """JAX/Pallas equivalent of BaseLoss wrapping an MSE(reduction='mean') loss."""

    def __init__(self, weight, *, target_block_bytes=TARGET_BLOCK_BYTES,
                 small_n_threshold=SMALL_N_THRESHOLD, check_finite=False):
        self.weight = weight
        self.target_block_bytes = int(target_block_bytes)
        self.small_n_threshold = int(small_n_threshold)
        # Mirrors the torch isinf/isnan guard, but stays on-device (no host
        # sync, jit-safe).  Off by default for the hot path.
        self.check_finite = check_finite

    def _guard(self, loss):
        if self.check_finite:
            lax.cond(jnp.isinf(loss),
                     lambda: jax.debug.print("[ERROR] INF LOSS!"),
                     lambda: None)
            lax.cond(jnp.isnan(loss),
                     lambda: jax.debug.print("[ERROR] NAN LOSS!"),
                     lambda: None)
            # TODO(synk): PyTorch drops into ipdb here; no interactive debugger
            # equivalent on a JAX/TPU path.
        return loss

    def __call__(self, pred, target):
        if self.weight == 0:
            # Matches the torch module's short-circuit (device f32 scalar).
            return jnp.zeros((), jnp.float32)

        n = int(pred.size)
        assert int(target.size) == n

        rows = n // LANES
        if n < self.small_n_threshold or rows < MIN_BLOCK_ROWS:
            # XLA's fused reduction is already at the HBM roofline here; the
            # kernel launch + pipeline prologue would dominate.
            d = pred.astype(jnp.float32) - target.astype(jnp.float32)
            return self._guard(jnp.float32(self.weight) * jnp.mean(d * d))

        flat_p = pred.reshape(-1)
        flat_t = target.reshape(-1)
        n_bulk = rows * LANES
        if n_bulk == n:
            # Copy-free reshape of a contiguous array: no extra HBM traffic.
            p2d = flat_p.reshape(rows, LANES)
            t2d = flat_t.reshape(rows, LANES)
            tail_sq = None
        else:
            # Non-lane-aligned size (rare): one bulk slice copy + tiny XLA tail.
            p2d = flat_p[:n_bulk].reshape(rows, LANES)
            t2d = flat_t[:n_bulk].reshape(rows, LANES)
            dt = (flat_p[n_bulk:].astype(jnp.float32)
                  - flat_t[n_bulk:].astype(jnp.float32))
            tail_sq = jnp.sum(dt * dt)

        # Size blocks by bytes so the pipeline step stays at the ~4 MiB sweet
        # spot regardless of input dtype.
        itemsize = max(pred.dtype.itemsize, target.dtype.itemsize)
        target_rows = max(
            CHUNK_ROWS,
            (self.target_block_bytes // (LANES * itemsize))
            // CHUNK_ROWS * CHUNK_ROWS)
        rows32 = (rows // MIN_BLOCK_ROWS) * MIN_BLOCK_ROWS
        block_rows = min(target_rows, rows32)
        chunk_rows = (CHUNK_ROWS if block_rows % CHUNK_ROWS == 0
                      else MIN_BLOCK_ROWS)
        total_blocks = _cdiv(rows, block_rows)
        num_shards = min(NUM_SHARDS, total_blocks)
        blocks_per_shard = _cdiv(total_blocks, num_shards)
        # Mask only when the grid's logical coverage exceeds the valid rows
        # (partial edge block and/or ragged shard split).
        needs_mask = num_shards * blocks_per_shard * block_rows != rows

        partials = _pallas_sq_err_partials(
            p2d, t2d,
            block_rows=block_rows, chunk_rows=chunk_rows,
            num_shards=num_shards, blocks_per_shard=blocks_per_shard,
            total_blocks=total_blocks, needs_mask=needs_mask)

        total = jnp.sum(partials)
        if tail_sq is not None:
            total = total + tail_sq

        # Mean over the *true* element count, then weight scaling.
        loss = jnp.float32(self.weight) * (total / jnp.float32(n))
        return self._guard(loss)


if __name__ == "__main__":
    key = jax.random.PRNGKey(0)
    ks = jax.random.split(key, 8)

    def ref_loss(w, p, t):
        d = p.astype(jnp.float32) - t.astype(jnp.float32)
        return jnp.float32(w) * jnp.mean(d * d)

    # Case 1: small conv-style NCHW input -> small-n XLA fast path.
    p1 = jax.random.normal(ks[0], (2, 4, 16, 16), dtype=jnp.float32)
    t1 = jax.random.normal(ks[1], (2, 4, 16, 16), dtype=jnp.float32)
    m1 = BaseLossPallas(weight=0.5)
    o1 = jax.block_until_ready(m1(p1, t1))
    assert jnp.allclose(o1, ref_loss(0.5, p1, t1), rtol=1e-4, atol=1e-5), o1

    # Case 2: Pallas path, 2 shards x 2 blocks/shard (small target_block_bytes
    # forces multi-step accumulation); lane-aligned, no masking; guard enabled.
    p2 = jax.random.normal(ks[2], (2, 4, 128, 128), dtype=jnp.float32)
    t2 = jax.random.normal(ks[3], (2, 4, 128, 128), dtype=jnp.float32)
    m2 = BaseLossPallas(weight=1.3, small_n_threshold=0,
                        target_block_bytes=256 * LANES * 4, check_finite=True)
    o2 = jax.block_until_ready(m2(p2, t2))
    assert jnp.allclose(o2, ref_loss(1.3, p2, t2), rtol=1e-4, atol=1e-5), o2

    # Case 3: non-multiple-of-128 size -> masked partial edge block + XLA tail,
    # multi-chunk in-kernel loop (block_rows=224, chunk_rows=32).
    p3 = jax.random.normal(ks[4], (4, 8, 30, 31), dtype=jnp.float32)
    t3 = jax.random.normal(ks[5], (4, 8, 30, 31), dtype=jnp.float32)
    m3 = BaseLossPallas(weight=0.7, small_n_threshold=0)
    o3 = jax.block_until_ready(m3(p3, t3))
    assert jnp.allclose(o3, ref_loss(0.7, p3, t3), rtol=1e-4, atol=1e-5), o3

    # Case 4: ragged shard split (3 blocks over 2 shards) -> exercises the
    # clamped index_map + fully-masked overflow grid step.
    p4 = jax.random.normal(ks[6], (2, 350, 128), dtype=jnp.float32)
    t4 = jax.random.normal(ks[7], (2, 350, 128), dtype=jnp.float32)
    m4 = BaseLossPallas(weight=2.0, small_n_threshold=0,
                        target_block_bytes=256 * LANES * 4)
    o4 = jax.block_until_ready(m4(p4, t4))
    assert jnp.allclose(o4, ref_loss(2.0, p4, t4), rtol=1e-4, atol=1e-5), o4

    # Case 5: weight == 0 short-circuit, matching the PyTorch module.
    assert float(BaseLossPallas(weight=0)(p1, t1)) == 0.0

    print("KERNEL_OK")
</pallas_src>

<mosaic_0001>
module attributes {stable_mosaic.version = 11 : i64} {
  func.func @kernel(%arg0: i32, %arg1: i32, %arg2: memref<256x128xf32, #tpu.memory_space<vmem>>, %arg3: memref<256x128xf32, #tpu.memory_space<vmem>>, %arg4: memref<8x128xf32, #tpu.memory_space<vmem>>) attributes {dimension_semantics = [#tpu.dimension_semantics<parallel>, #tpu.dimension_semantics<arbitrary>], iteration_bounds = array<i64: 2, 2>, scalar_prefetch = 0 : i64, scratch_operands = 0 : i64, tpu.core_type = #tpu.core_type<tc>, window_params = [{transform_indices = @transform_0, window_bounds = array<i64: 256, 128>}, {transform_indices = @transform_1, window_bounds = array<i64: 256, 128>}, {transform_indices = @transform_2, window_bounds = array<i64: 8, 128>}]} {
    %c0_i32 = arith.constant 0 : i32
    %0 = arith.cmpi eq, %arg1, %c0_i32 : i32
    %1 = arith.extui %0 : i1 to i32
    %c0_i32_0 = arith.constant 0 : i32
    %2 = arith.cmpi ne, %1, %c0_i32_0 : i32
    scf.if %2 {
      %cst_8 = arith.constant 0.000000e+00 : f32
      %18 = vector.broadcast %cst_8 : f32 to vector<8x128xf32>
      %c0_9 = arith.constant 0 : index
      %c0_10 = arith.constant 0 : index
      %19 = vector.load %arg4[%c0_9, %c0_10] : memref<8x128xf32, #tpu.memory_space<vmem>>, vector<8x128xf32>
      tpu.vector_store %arg4[%c0_9, %c0_10], %18 {strides = array<i32>} : memref<8x128xf32, #tpu.memory_space<vmem>>, vector<8x128xf32>,
    } else {
    }
    %cst = arith.constant 0.000000e+00 : f32
    %3 = vector.broadcast %cst : f32 to vector<8x128xf32>
    %c0 = arith.constant 0 : index
    %c0_1 = arith.constant 0 : index
    %4 = vector.load %arg4[%c0, %c0_1] : memref<8x128xf32, #tpu.memory_space<vmem>>, vector<8x128xf32>
    %c0_i32_2 = arith.constant 0 : i32
    %c256_i32 = arith.constant 256 : i32
    %5 = arith.muli %c0_i32_2, %c256_i32 : i32
    %6 = tpu.assume_multiple %5, 256 : i32
    %7 = arith.index_cast %6 : i32 to index
    %c0_3 = arith.constant 0 : index
    %8 = vector.load %arg2[%7, %c0_3] : memref<256x128xf32, #tpu.memory_space<vmem>>, vector<256x128xf32>
    %9 = arith.index_cast %6 : i32 to index
    %c0_4 = arith.constant 0 : index
    %10 = vector.load %arg3[%9, %c0_4] : memref<256x128xf32, #tpu.memory_space<vmem>>, vector<256x128xf32>
    %11 = arith.subf %8, %10 : vector<256x128xf32>
    %12 = arith.mulf %11, %11 : vector<256x128xf32>
    %13 = vector.shape_cast %12 : vector<256x128xf32> to vector<32x8x128xf32>
    %cst_5 = arith.constant dense<0.000000e+00> : vector<8x128xf32>
    %14 = vector.multi_reduction <add>, %13, %cst_5 [0] : vector<32x8x128xf32> to vector<8x128xf32>
    %15 = arith.addf %3, %14 : vector<8x128xf32>
    %c1_i32 = arith.constant 1 : i32
    %16 = arith.addf %4, %15 : vector<8x128xf32>
    %c0_6 = arith.constant 0 : index
    %c0_7 = arith.constant 0 : index
    %17 = vector.load %arg4[%c0_6, %c0_7] : memref<8x128xf32, #tpu.memory_space<vmem>>, vector<8x128xf32>
    tpu.vector_store %arg4[%c0_6, %c0_7], %16 {strides = array<i32>} : memref<8x128xf32, #tpu.memory_space<vmem>>, vector<8x128xf32>,
    return
  }
  func.func @transform_0(%arg0: i32, %arg1: i32) -> (i32, i32) {
    %c2_i32 = arith.constant 2 : i32
    %0 = arith.muli %arg0, %c2_i32 : i32
    %1 = arith.addi %0, %arg1 : i32
    %c3_i32 = arith.constant 3 : i32
    %2 = arith.minsi %1, %c3_i32 : i32
    %c0_i32 = arith.constant 0 : i32
    %c0_i32_0 = arith.constant 0 : i32
    return %2, %c0_i32 : i32, i32
  }
  func.func @transform_1(%arg0: i32, %arg1: i32) -> (i32, i32) {
    %c2_i32 = arith.constant 2 : i32
    %0 = arith.muli %arg0, %c2_i32 : i32
    %1 = arith.addi %0, %arg1 : i32
    %c3_i32 = arith.constant 3 : i32
    %2 = arith.minsi %1, %c3_i32 : i32
    %c0_i32 = arith.constant 0 : i32
    %c0_i32_0 = arith.constant 0 : i32
    return %2, %c0_i32 : i32, i32
  }
  func.func @transform_2(%arg0: i32, %arg1: i32) -> (i32, i32) {
    %c0_i32 = arith.constant 0 : i32
    %c0_i32_0 = arith.constant 0 : i32
    return %arg0, %c0_i32 : i32, i32
  }
}

</mosaic_0001>

<bundles_post_ra>
// kernel: tpu_custom_call.1
= control target key start
LH: loop header
LB: loop body
LE: loop exit
PB: predicated region body
PF: predicated region fallthrough
CT: control target
= control target key end

     0   :  { %s1249_s0 = inlined_call_operand.hbm [shape: f32[1024,128], index: 0, kind: input, shape index: {}]   ;;  %s1250_s1 = inlined_call_operand.hbm [shape: f32[1024,128], index: 1, kind: input, shape index: {}]   ;;  %s1251_s2 = inlined_call_operand.hbm [shape: f32[16,128], index: 2, kind: output, shape index: {}]  }
   0x1   :  { %1260 = sst [smem:[#allocation15_spill]] %s1249_s0 }
   0x2   :  { %7 = vsyncpa [#allocation3], 0 }
   0x3   :  { %9 = vsyncpa [#allocation3 + $0x1], 0 }
   0x4   :  { %10 = vsyncpa [#allocation6], 0 }
   0x5   :  { %12 = vsyncpa [#allocation6 + $0x1], 0 }
   0x6   :  { %13 = vsyncpa [#allocation4], 0 }
   0x7   :  { %15 = vsyncpa [#allocation4 + $0x1], 0  ;;  %s880_s9 = smov 0   ;;  %s882_s10 = smov 0  }
   0x8   :  { %s884_s11 = smov 0   ;;  %s886_s12 = smov 0  }
   0x9   :  { %s888_s13 = smov 0   ;;  %s890_s14 = smov 0  }
   0xa   :  { %s892_s15 = smov 0   ;;  %s894_s16 = smov 0  }
   0xb   :  { %s896_s17 = smov 0   ;;  %s898_s18 = smov 0  }
   0xc   :  { %s900_s19 = smov 0  }
   0xd LB: > { %1261 = sst [smem:[#allocation11_spill]] %s849_s17  ;;  %s534_s20 = sadd.s32 4294967295, %s857_s19   ;;  %s857_s19 = sphi %s900_s19, %s21_s19   ;;  %s853_s18 = sphi %s898_s18, %s1281_s18   ;;  %s849_s17 = sphi %s896_s17, %s1280_s17   ;;  %s845_s16 = sphi %s894_s16, %s1279_s16   ;;  %s841_s15 = sphi %s892_s15, %s1278_s15   ;;  %s837_s14 = sphi %s890_s14, %s1287_s14   ;;  %s833_s13 = sphi %s888_s13, %s1286_s13   ;;  %s829_s12 = sphi %s886_s12, %s1285_s12   ;;  %s825_s11 = sphi %s884_s11, %s1284_s11   ;;  %s821_s10 = sphi %s882_s10, %s1283_s10   ;;  %s817_s9 = sphi %s880_s9, %s1282_s9  }
   0xe   : > { %1262 = sst [smem:[#allocation12_spill]] %s853_s18  ;;  %s535_s21 = sadd.s32 4294967294, %s857_s19  }
   0xf   : > { %s30_s22 = sadd.s32 1, %s849_s17  ;;  %s33_s23 = sadd.s32 1, %s853_s18 }
  0x10   : > { %p31_p0 = scmp.ge.s32.totalorder %s30_s22, 2  ;;  %s536_s24 = sshll.u32 %s853_s18, 1 }
  0x11   : > { %s38_s25 = sadd.s32 %s849_s17, %s536_s24  ;;  %s48_s26 = sadd.s32 1, %s837_s14 }
  0x12   : > { %s1289_s22 = smov (%p31_p0, %s30_s22), 0  ;;  %s1291_s23 = smov (!%p31_p0, %s33_s23), %s853_s18 }
  0x13   : > { %1263 = sst [smem:[#allocation13_spill]] %s1289_s22  ;;  %p39_p1 = scmp.lt.s32.totalorder %s38_s25, 3 }
  0x14   : > { %p55_p2 = scmp.ne.s32.totalorder %s837_s14, %s833_s13  ;;  %p35_p3 = scmp.ge.s32.totalorder %s1291_s23, 2 }
  0x15   : > { %p56_p4 = scmp.eq.s32.totalorder %s857_s19, 0  ;;  %s1293_s25 = smov (!%p39_p1, %s38_s25), 3 }
  0x16   : > { %s1295_s23 = smov (%p35_p3, %s1291_s23), 0  ;;  %p61_p6 = scmp.ne.s32.totalorder %s833_s13, %s829_s12 }
  0x17   : > { %1264 = sst [smem:[#allocation14_spill]] %s1295_s23  ;;  %p952_p5 = por %p56_p4, %p55_p2 }
  0x18   : > { %s537_s28 = sshll.u32 %s1295_s23, 1  ;;  %p62_p7 = scmp.eq.s32.totalorder %s534_s20, 0 }
  0x19   : > { %s42_s29 = sadd.s32 %s537_s28, %s1289_s22  ;;  %s105_s30 = ssub.s32 %s853_s18, %s1295_s23 }
  0x1a   : > { %p43_p8 = scmp.lt.s32.totalorder %s42_s29, 3  ;;  %p964_p9 = por %p62_p7, %p61_p6 }
  0x1b   : > { %p106_p10 = scmp.eq.s32.totalorder %s105_s30, 0  ;;  %s108_s4 = sadd.s32 1, %s825_s11 }
  0x1c   : > { %s1266_s3 = scalar_select %p964_p9, 1, 0 }
  0x1d   : > { %s1297_s29 = smov (!%p43_p8, %s42_s29), 3  ;;  %p118_p11 = scmp.ne.s32.totalorder %s825_s11, %s821_s10 }
  0x1e   : > { %s970_s5 = scalar_select %p106_p10, %s825_s11, %s108_s4  }
  0x1f   : > { %s45_s6 = ssub.s32 %s1293_s25, %s1297_s29  ;;  %p119_p13 = scmp.eq.s32.totalorder %s534_s20, 3 }
  0x20   : > { %p46_p12 = scmp.eq.s32.totalorder %s45_s6, 0  ;;  %p124_p0 = scmp.ne.s32.totalorder %s821_s10, %s817_s9 }
  0x21   : > { %p125_p1 = scmp.eq.s32.totalorder %s535_s21, 3  ;;  %p984_p2 = por %p119_p13, %p118_p11 }
  0x22   : > { %s982_s7 = scalar_select %p46_p12, %s837_s14, %s48_s26  }
  0x23   : > { %s1267_s8 = scalar_select %p984_p2, 1, 0 }
  0x24   : > { %p988_p3 = por %p125_p1, %p124_p0  ;;  %p578_p4 = scmp.lt.s32.totalorder %s857_s19, 4 }
  0x25   : > { %s994_s24 = sand.u32 1, %s837_s14   ;;  %s1254_s20 = sshll.u32 %s1293_s25, 12 }
  0x26   : > { %s1268_s12 = scalar_select %p988_p3, 1, 0 }
  0x27   : > { %s1253_s28 = sshll.u32 %s994_s24, 8  ;;  %s1269_s0 = sld [smem:[#allocation15_spill]] }
  0x28   : > { %s149_s30 = scalar_lea.vmem [#allocation2], %s1253_s28  ;;  %p1009_p6 = pnand %p578_p4, %p952_p5 }
  0x29   : > { %s160_s4 = sshll.u32 %s149_s30, 4  ;;  %s1013_s4 = int_to_ptr.vmem [resolvable:$true] %s160_s4 }
  0x2a   : > { %p673_p8 = pneg %p1009_p6 }
  0x2d   : > { %s1003_s29 = scalar_lea.hbm %s1269_s0, %s1254_s20  ;;  %s676_s27 = scalar_lea.hbm %s1269_s0, 16384 }
  0x2e   : > { %s671_s21 = scalar_lea.hbm %s1003_s29, 4096  ;;  %p677_p5 = scmp.lt.u32.totalorder %s1003_s29, %s1269_s0 }
  0x2f   : > { %p672_p7 = scmp.ne.s32.totalorder %s1003_s29, %s671_s21  ;;  %p678_p12 = scmp.lt.u32.totalorder %s676_s27, %s671_s21 }
  0x30   : > { %p680_p0 = scmp.lt.u32.totalorder %s671_s21, %s1003_s29 }
  0x31   : > { %p674_p10 = pnand %p673_p8, %p672_p7  ;;  %p679_p13 = por %p678_p12, %p677_p5 }
  0x33   : > { %p675_p11 = pneg %p674_p10  ;;  %p681_p1 = por %p680_p0, %p679_p13 }
  0x35   : > { %p682_p4 = pnand %p681_p1, %p675_p11 }
  0x37   : > { %685 = shalt.err (!%p682_p4)
}
  0x38   : > { %s686_s23 = scalar_lea.vmem %s1013_s4, 4096  ;;  %s859_s26 = smov [#allocation2]  }
  0x39   : > { %p687_p7 = scmp.ne.s32.totalorder %s1013_s4, %s686_s23  ;;  %s691_s30 = sshll.u32 %s859_s26, 4  ;;  %s692_s30 = int_to_ptr.vmem [resolvable:$false] %s691_s30 }
  0x3a   : > { %s693_s20 = scalar_lea.vmem %s692_s30, 8192  ;;  %p694_p2 = scmp.lt.s32.totalorder %s1013_s4, %s692_s30 }
  0x3b   : > { %p689_p10 = pnand %p687_p7, %p673_p8  ;;  %p695_p5 = scmp.lt.s32.totalorder %s693_s20, %s686_s23 }
  0x3d   : > { %p690_p3 = pneg %p689_p10  ;;  %p696_p12 = por %p695_p5, %p694_p2 }
  0x3f   : > { %p697_p13 = pnand %p696_p12, %p690_p3 }
  0x41   : > { %700 = shalt.err (!%p697_p13)
}
  0x42   : > { %s860_s28 = smov 128   ;;  %s861_s21 = smov 8  }
  0x43   : > { %s1271_s23 = scalar_lea.sflag [#allocation3], %s994_s24  ;;  %p550_p2 = scmp.ge.s32.totalorder %s857_s19, 1 }
  0x44   : > { %570 = dma.hbm_to_vmem [thread:$0]  (!%p1009_p6), %s1003_s29, 4096, %s1013_s4, %s1271_s23, %s860_s28, %s860_s28, %s861_s21  }
  0x45   : > { %p193_p3 = scmp.lt.s32.totalorder %s857_s19, 5  ;;  %s1273_s26 = sshll.u32 %s1293_s25, 12 }
  0x46   : > { %s1057_s0 = scalar_lea.hbm %s1250_s1, %s1273_s26  ;;  %s1274_s22 = sshll.u32 %s994_s24, 8 }
  0x47   : > { %p1048_p11 = pnand %p550_p2, %p193_p3  ;;  %s174_s18 = scalar_lea.vmem [#allocation5], %s1274_s22 }
  0x48   : > { %s185_s17 = sshll.u32 %s174_s18, 4  ;;  %s171_s29 = scalar_lea.sflag [#allocation6], %s994_s24  ;;  %s1061_s17 = int_to_ptr.vmem [resolvable:$true] %s185_s17 }
  0x49   : > { %s701_s4 = scalar_lea.hbm %s1057_s0, 4096  ;;  %s706_s26 = scalar_lea.hbm %s1250_s1, 16384 }
  0x4a   : > { %p702_p0 = scmp.ne.s32.totalorder %s1057_s0, %s701_s4  ;;  %p707_p7 = scmp.lt.u32.totalorder %s1057_s0, %s1250_s1 }
  0x4b   : > { %p708_p10 = scmp.lt.u32.totalorder %s706_s26, %s701_s4  ;;  %p710_p12 = scmp.lt.u32.totalorder %s701_s4, %s1057_s0 }
  0x4c   : > { %p704_p1 = pnand %p702_p0, %p673_p8 }
  0x4d   : > { %p709_p5 = por %p708_p10, %p707_p7 }
  0x4e   : > { %p705_p4 = pneg %p704_p1 }
  0x4f   : > { %p711_p13 = por %p710_p12, %p709_p5 }
  0x51   : > { %p712_p2 = pnand %p711_p13, %p705_p4 }
  0x53   : > { %715 = shalt.err (!%p712_p2)
}
  0x54   : > { %s716_s18 = scalar_lea.vmem %s1061_s17, 4096  ;;  %s862_s22 = smov [#allocation5]  }
  0x55   : > { %p717_p3 = scmp.ne.s32.totalorder %s1061_s17, %s716_s18  ;;  %s721_s25 = sshll.u32 %s862_s22, 4  ;;  %s722_s25 = int_to_ptr.vmem [resolvable:$false] %s721_s25 }
  0x56   : > { %s723_s23 = scalar_lea.vmem %s722_s25, 8192  ;;  %p724_p9 = scmp.lt.s32.totalorder %s1061_s17, %s722_s25 }
  0x57   : > { %p719_p0 = pnand %p717_p3, %p673_p8  ;;  %p725_p7 = scmp.lt.s32.totalorder %s723_s23, %s716_s18 }
  0x59   : > { %p720_p1 = pneg %p719_p0  ;;  %p726_p10 = por %p725_p7, %p724_p9 }
  0x5b   : > { %p727_p5 = pnand %p726_p10, %p720_p1 }
  0x5d   : > { %730 = shalt.err (!%p727_p5)
}
  0x5e   : > { %573 = dma.hbm_to_vmem [thread:$0]  (!%p1009_p6), %s1057_s0, 4096, %s1061_s17, %s171_s29, %s860_s28, %s860_s28, %s861_s21  }
  0x5f   : > { %197 = sbr.rel (%p1048_p11) target bundleno = 198 (0xc6), region = 28  ;;  %s199_s4 = sand.u32 (!%p1048_p11), 1, %s833_s13  }
  0x60   : > { %s551_s26 = sshll.u32 (!%p1048_p11), %s199_s4, 8  ;;  %s200_s30 = scalar_lea.sflag (!%p1048_p11), [#allocation3], %s199_s4 }
  0x61   : > { %s1095_s20 = scalar_lea.vmem (!%p1048_p11), [#allocation2], %s551_s26  ;;  %p1275_p9 = scmp.ne.s32.totalorder (!%p1048_p11), %s1266_s3, 0 }
  0x66   : > { %804 = dma.done.wait (%p1275_p9), %s200_s30, 4096  }
  0x67   : > { %806 = vsyncadd (%p1275_p9), %s200_s30, 4294963200  ;;  %s209_s24 = scalar_lea.sflag [#allocation6], %s199_s4  ;;  %s1101_s6 = scalar_lea.vmem [#allocation5], %s551_s26 }
  0x68   : > { %808 = dma.done.wait (%p1275_p9), %s209_s24, 4096  }
  0x69   : > { %810 = vsyncadd (%p1275_p9), %s209_s24, 4294963200  ;;  %s235_s0 = sand.u32 1, %s821_s10   ;;  %p554_p6 = scmp.ne.s32.totalorder %s841_s15, 0 }
  0x6a   : > { %s553_s17 = sshll.u32 %s235_s0, 3  ;;  %v863_v0 = vmov (!%p554_p6), 0.0  }
  0x6b   : > { %s1110_s28 = scalar_lea.vmem [#allocation7], %s553_s17  ;;  %251 = sbr.rel (%p554_p6) target bundleno = 114 (0x72), region = 40 }
  0x6c   : > { %252 = vst [vmem:[%s1110_s28] sm:$0xff] (!%p554_p6), %v863_v0 }
  0x72 PF: > { %v254_v1 = vld [vmem:[%s1095_s20] sm:$0xff]  ;;  %v255_v2 = vld [vmem:[%s1095_s20 + $0x8] sm:$0xff]  ;;  %v256_v5 = vld [vmem:[%s1095_s20 + $0x10] sm:$0xff]  ;;  %s556_s15 = sshll.u32 %s845_s16, 7  ;;  %s430_s3 = sshll.u32 %s1110_s28, 4  ;;  %s1186_s3 = int_to_ptr.vmem [resolvable:$true] %s430_s3 }
  0x73   : > { %v286_v3 = vld [vmem:[%s1101_s6] sm:$0xff]  ;;  %v287_v4 = vld [vmem:[%s1101_s6 + $0x8] sm:$0xff]  ;;  %v288_v6 = vld [vmem:[%s1101_s6 + $0x10] sm:$0xff]  ;;  %s1184_s29 = scalar_lea.hbm %s1251_s2, %s556_s15  ;;  %s417_s18 = scalar_lea.sflag [#allocation4], %s235_s0 }
  0x74   : > { %v318_v7 = vsub.f32 %v254_v1, %v286_v3  ;;  %v319_v8 = vsub.f32 %v255_v2, %v287_v4  ;;  %v257_v9 = vld [vmem:[%s1095_s20 + $0x18] sm:$0xff]  ;;  %v320_v11 = vsub.f32 %v256_v5, %v288_v6  ;;  %v258_v12 = vld [vmem:[%s1095_s20 + $0x20] sm:$0xff]  ;;  %v259_v17 = vld [vmem:[%s1095_s20 + $0x28] sm:$0xff]  ;;  %s731_s22 = scalar_lea.vmem %s1186_s3, 128  ;;  %p1276_p11 = scmp.ne.s32.totalorder %s1267_s8, 0 }
  0x75   : > { %v289_v10 = vld [vmem:[%s1101_s6 + $0x18] sm:$0xff]  ;;  %v290_v13 = vld [vmem:[%s1101_s6 + $0x20] sm:$0xff]  ;;  %v291_v18 = vld [vmem:[%s1101_s6 + $0x28] sm:$0xff]  ;;  %p732_p8 = scmp.ne.s32.totalorder %s1186_s3, %s731_s22  ;;  %s864_s16 = smov [#allocation7]  }
  0x76   : > { %v321_v14 = vsub.f32 %v257_v9, %v289_v10  ;;  %v350_v15 = vmul.f32 %v318_v7, %v318_v7  ;;  %v351_v16 = vmul.f32 %v319_v8, %v319_v8  ;;  %v322_v19 = vsub.f32 %v258_v12, %v290_v13  ;;  %v260_v21 = vld [vmem:[%s1095_s20 + $0x30] sm:$0xff]  ;;  %v261_v26 = vld [vmem:[%s1095_s20 + $0x38] sm:$0xff]  ;;  %v262_v31 = vld [vmem:[%s1095_s20 + $0x40] sm:$0xff]  ;;  %s735_s25 = sshll.u32 %s864_s16, 4  ;;  %s736_s25 = int_to_ptr.vmem [resolvable:$false] %s735_s25 }
  0x77   : > { %v352_v20 = vmul.f32 %v320_v11, %v320_v11  ;;  %v292_v22 = vld [vmem:[%s1101_s6 + $0x30] sm:$0xff]  ;;  %v323_v23 = vsub.f32 %v259_v17, %v291_v18  ;;  %v293_v27 = vld [vmem:[%s1101_s6 + $0x38] sm:$0xff]  ;;  %v294_v32 = vld [vmem:[%s1101_s6 + $0x40] sm:$0xff]  ;;  %p733_p4 = pnand %p732_p8, %p1276_p11  ;;  %s737_s23 = scalar_lea.vmem %s736_s25, 256 }
  0x78   : > { %v353_v24 = vmul.f32 %v321_v14, %v321_v14  ;;  %v382_v25 = vadd.f32 %v351_v16, %v350_v15  ;;  %v324_v28 = vsub.f32 %v260_v21, %v292_v22  ;;  %v354_v29 = vmul.f32 %v322_v19, %v322_v19  ;;  %v263_v36 = vld [vmem:[%s1095_s20 + $0x48] sm:$0xff]  ;;  %v264_v41 = vld [vmem:[%s1095_s20 + $0x50] sm:$0xff]  ;;  %v265_v46 = vld [vmem:[%s1095_s20 + $0x58] sm:$0xff]  ;;  %p738_p13 = scmp.lt.s32.totalorder %s1186_s3, %s736_s25  ;;  %p739_p2 = scmp.lt.s32.totalorder %s737_s23, %s731_s22 }
  0x79   : > { %v325_v33 = vsub.f32 %v261_v26, %v293_v27  ;;  %v355_v34 = vmul.f32 %v323_v23, %v323_v23  ;;  %v295_v37 = vld [vmem:[%s1101_s6 + $0x48] sm:$0xff]  ;;  %v326_v38 = vsub.f32 %v262_v31, %v294_v32  ;;  %v296_v42 = vld [vmem:[%s1101_s6 + $0x50] sm:$0xff]  ;;  %v297_v47 = vld [vmem:[%s1101_s6 + $0x58] sm:$0xff]  ;;  %p734_p12 = pneg %p733_p4 }
  0x7a   : > { %v383_v30 = vadd.f32 %v382_v25, %v352_v20  ;;  %v356_v39 = vmul.f32 %v324_v28, %v324_v28  ;;  %v327_v43 = vsub.f32 %v263_v36, %v295_v37  ;;  %v328_v48 = vsub.f32 %v264_v41, %v296_v42  ;;  %v266_v51 = vld [vmem:[%s1095_s20 + $0x60] sm:$0xff]  ;;  %v267_v56 = vld [vmem:[%s1095_s20 + $0x68] sm:$0xff]  ;;  %v268_v61 = vld [vmem:[%s1095_s20 + $0x70] sm:$0xff]  ;;  %p740_p3 = por %p739_p2, %p738_p13 }
  0x7b   : > { %v357_v44 = vmul.f32 %v325_v33, %v325_v33  ;;  %v358_v49 = vmul.f32 %v326_v38, %v326_v38  ;;  %v298_v52 = vld [vmem:[%s1101_s6 + $0x60] sm:$0xff]  ;;  %v329_v53 = vsub.f32 %v265_v46, %v297_v47  ;;  %v299_v57 = vld [vmem:[%s1101_s6 + $0x68] sm:$0xff]  ;;  %v300_v62 = vld [vmem:[%s1101_s6 + $0x70] sm:$0xff] }
  0x7c   : > { %v384_v35 = vadd.f32 %v383_v30, %v353_v24  ;;  %v359_v54 = vmul.f32 %v327_v43, %v327_v43  ;;  %v330_v58 = vsub.f32 %v266_v51, %v298_v52  ;;  %v360_v59 = vmul.f32 %v328_v48, %v328_v48  ;;  %v269_v2 = vld [vmem:[%s1095_s20 + $0x78] sm:$0xff]  ;;  %v270_v7 = vld [vmem:[%s1095_s20 + $0x80] sm:$0xff]  ;;  %v271_v12 = vld [vmem:[%s1095_s20 + $0x88] sm:$0xff]  ;;  %p741_p0 = pnand %p740_p3, %p734_p12 }
  0x7d   : > { %v331_v63 = vsub.f32 %v267_v56, %v299_v57  ;;  %v361_v0 = vmul.f32 %v329_v53, %v329_v53  ;;  %v301_v3 = vld [vmem:[%s1101_s6 + $0x78] sm:$0xff]  ;;  %v332_v4 = vsub.f32 %v268_v61, %v300_v62  ;;  %v302_v8 = vld [vmem:[%s1101_s6 + $0x80] sm:$0xff]  ;;  %v303_v13 = vld [vmem:[%s1101_s6 + $0x88] sm:$0xff] }
  0x7e   : > { %v385_v40 = vadd.f32 %v384_v35, %v354_v29  ;;  %v362_v5 = vmul.f32 %v330_v58, %v330_v58  ;;  %v333_v9 = vsub.f32 %v269_v2, %v301_v3  ;;  %v334_v14 = vsub.f32 %v270_v7, %v302_v8  ;;  %v272_v17 = vld [vmem:[%s1095_s20 + $0x90] sm:$0xff]  ;;  %v273_v22 = vld [vmem:[%s1095_s20 + $0x98] sm:$0xff]  ;;  %v274_v27 = vld [vmem:[%s1095_s20 + $0xa0] sm:$0xff] }
  0x7f   : > { %v363_v10 = vmul.f32 %v331_v63, %v331_v63  ;;  %v364_v15 = vmul.f32 %v332_v4, %v332_v4  ;;  %v304_v18 = vld [vmem:[%s1101_s6 + $0x90] sm:$0xff]  ;;  %v335_v19 = vsub.f32 %v271_v12, %v303_v13  ;;  %v305_v23 = vld [vmem:[%s1101_s6 + $0x98] sm:$0xff]  ;;  %v306_v28 = vld [vmem:[%s1101_s6 + $0xa0] sm:$0xff] }
  0x80   : > { %v386_v45 = vadd.f32 %v385_v40, %v355_v34  ;;  %v365_v20 = vmul.f32 %v333_v9, %v333_v9  ;;  %v336_v24 = vsub.f32 %v272_v17, %v304_v18  ;;  %v366_v25 = vmul.f32 %v334_v14, %v334_v14  ;;  %v275_v32 = vld [vmem:[%s1095_s20 + $0xa8] sm:$0xff]  ;;  %v276_v37 = vld [vmem:[%s1095_s20 + $0xb0] sm:$0xff]  ;;  %v277_v42 = vld [vmem:[%s1095_s20 + $0xb8] sm:$0xff] }
  0x81   : > { %v337_v29 = vsub.f32 %v273_v22, %v305_v23  ;;  %v367_v30 = vmul.f32 %v335_v19, %v335_v19  ;;  %v307_v33 = vld [vmem:[%s1101_s6 + $0xa8] sm:$0xff]  ;;  %v338_v34 = vsub.f32 %v274_v27, %v306_v28  ;;  %v308_v38 = vld [vmem:[%s1101_s6 + $0xb0] sm:$0xff]  ;;  %v309_v43 = vld [vmem:[%s1101_s6 + $0xb8] sm:$0xff] }
  0x82   : > { %v387_v50 = vadd.f32 %v386_v45, %v356_v39  ;;  %v368_v35 = vmul.f32 %v336_v24, %v336_v24  ;;  %v339_v39 = vsub.f32 %v275_v32, %v307_v33  ;;  %v278_v47 = vld [vmem:[%s1095_s20 + $0xc0] sm:$0xff]  ;;  %v279_v52 = vld [vmem:[%s1095_s20 + $0xc8] sm:$0xff]  ;;  %v280_v57 = vld [vmem:[%s1095_s20 + $0xd0] sm:$0xff] }
  0x83   : > { %v369_v40 = vmul.f32 %v337_v29, %v337_v29  ;;  %v370_v45 = vmul.f32 %v338_v34, %v338_v34  ;;  %v310_v48 = vld [vmem:[%s1101_s6 + $0xc0] sm:$0xff]  ;;  %v311_v53 = vld [vmem:[%s1101_s6 + $0xc8] sm:$0xff]  ;;  %v312_v58 = vld [vmem:[%s1101_s6 + $0xd0] sm:$0xff] }
  0x84   : > { %v388_v55 = vadd.f32 %v387_v50, %v357_v44  ;;  %v340_v44 = vsub.f32 %v276_v37, %v308_v38  ;;  %v371_v50 = vmul.f32 %v339_v39, %v339_v39  ;;  %v281_v62 = vld [vmem:[%s1095_s20 + $0xd8] sm:$0xff]  ;;  %v282_v3 = vld [vmem:[%s1095_s20 + $0xe0] sm:$0xff]  ;;  %v283_v8 = vld [vmem:[%s1095_s20 + $0xe8] sm:$0xff] }
  0x85   : > { %v313_v63 = vld [vmem:[%s1101_s6 + $0xd8] sm:$0xff]  ;;  %v314_v4 = vld [vmem:[%s1101_s6 + $0xe0] sm:$0xff]  ;;  %v315_v9 = vld [vmem:[%s1101_s6 + $0xe8] sm:$0xff] }
  0x86   : > { %v389_v60 = vadd.f32 %v388_v55, %v358_v49  ;;  %v341_v49 = vsub.f32 %v277_v42, %v309_v43  ;;  %v372_v55 = vmul.f32 %v340_v44, %v340_v44  ;;  %v284_v13 = vld [vmem:[%s1095_s20 + $0xf0] sm:$0xff]  ;;  %v285_v18 = vld [vmem:[%s1095_s20 + $0xf8] sm:$0xff] }
  0x87   : > { %v316_v14 = vld [vmem:[%s1101_s6 + $0xf0] sm:$0xff]  ;;  %v317_v19 = vld [vmem:[%s1101_s6 + $0xf8] sm:$0xff] }
  0x88   : > { %v390_v1 = vadd.f32 %v389_v60, %v359_v54  ;;  %v342_v54 = vsub.f32 %v278_v47, %v310_v48  ;;  %v373_v60 = vmul.f32 %v341_v49, %v341_v49  ;;  %v349_v23 = vsub.f32 %v285_v18, %v317_v19 }
  0x8a   : > { %v391_v6 = vadd.f32 %v390_v1, %v360_v59  ;;  %v343_v59 = vsub.f32 %v279_v52, %v311_v53  ;;  %v374_v1 = vmul.f32 %v342_v54, %v342_v54  ;;  %v381_v28 = vmul.f32 %v349_v23, %v349_v23 }
  0x8c   : > { %v392_v11 = vadd.f32 %v391_v6, %v361_v0  ;;  %v344_v0 = vsub.f32 %v280_v57, %v312_v58  ;;  %v375_v6 = vmul.f32 %v343_v59, %v343_v59 }
  0x8e   : > { %v393_v16 = vadd.f32 %v392_v11, %v362_v5  ;;  %v345_v5 = vsub.f32 %v281_v62, %v313_v63  ;;  %v376_v11 = vmul.f32 %v344_v0, %v344_v0 }
  0x90   : > { %v394_v21 = vadd.f32 %v393_v16, %v363_v10  ;;  %v346_v10 = vsub.f32 %v282_v3, %v314_v4  ;;  %v377_v16 = vmul.f32 %v345_v5, %v345_v5 }
  0x92   : > { %v395_v26 = vadd.f32 %v394_v21, %v364_v15  ;;  %v347_v15 = vsub.f32 %v283_v8, %v315_v9  ;;  %v378_v21 = vmul.f32 %v346_v10, %v346_v10 }
  0x94   : > { %v396_v31 = vadd.f32 %v395_v26, %v365_v20  ;;  %v348_v20 = vsub.f32 %v284_v13, %v316_v14  ;;  %v379_v24 = vmul.f32 %v347_v15, %v347_v15 }
  0x96   : > { %v397_v36 = vadd.f32 %v396_v31, %v366_v25  ;;  %v380_v26 = vmul.f32 %v348_v20, %v348_v20  ;;  %v253_v31 = vld [vmem:[%s1110_s28] sm:$0xff] }
  0x98   : > { %v398_v41 = vadd.f32 %v397_v36, %v367_v30 }
  0x9a   : > { %v399_v46 = vadd.f32 %v398_v41, %v368_v35 }
  0x9c   : > { %v400_v51 = vadd.f32 %v399_v46, %v369_v40 }
  0x9e   : > { %v401_v56 = vadd.f32 %v400_v51, %v370_v45 }
  0xa0   : > { %v402_v61 = vadd.f32 %v401_v56, %v371_v50 }
  0xa2   : > { %v403_v2 = vadd.f32 %v402_v61, %v372_v55 }
  0xa4   : > { %v404_v7 = vadd.f32 %v403_v2, %v373_v60 }
  0xa6   : > { %v405_v12 = vadd.f32 %v404_v7, %v374_v1 }
  0xa8   : > { %v406_v17 = vadd.f32 %v405_v12, %v375_v6 }
  0xaa   : > { %v407_v22 = vadd.f32 %v406_v17, %v376_v11 }
  0xac   : > { %v408_v25 = vadd.f32 %v407_v22, %v377_v16 }
  0xae   : > { %v409_v27 = vadd.f32 %v408_v25, %v378_v21 }
  0xb0   : > { %v410_v29 = vadd.f32 %v409_v27, %v379_v24 }
  0xb2   : > { %v411_v30 = vadd.f32 %v410_v29, %v380_v26 }
  0xb4   : > { %v412_v32 = vadd.f32 %v411_v30, %v381_v28 }
  0xb6   : > { %v414_v33 = vadd.f32 %v412_v32, %v253_v31 }
  0xb8   : > { %415 = vst [vmem:[%s1110_s28] sm:$0xff] %v414_v33 }
  0xb9   : > { %744 = shalt.err (!%p741_p0)
}
  0xba   : > { %s745_s4 = scalar_lea.hbm %s1184_s29, 128  ;;  %s749_s20 = scalar_lea.hbm %s1251_s2, 256 }
  0xbb   : > { %p746_p1 = scmp.ne.s32.totalorder %s1184_s29, %s745_s4  ;;  %p750_p5 = scmp.lt.u32.totalorder %s1184_s29, %s1251_s2 }
  0xbc   : > { %p751_p9 = scmp.lt.u32.totalorder %s749_s20, %s745_s4  ;;  %p753_p8 = scmp.lt.u32.totalorder %s745_s4, %s1184_s29 }
  0xbd   : > { %p747_p7 = pnand %p746_p1, %p1276_p11 }
  0xbe   : > { %p752_p6 = por %p751_p9, %p750_p5 }
  0xbf   : > { %p748_p10 = pneg %p747_p7 }
  0xc0   : > { %p754_p4 = por %p753_p8, %p752_p6 }
  0xc2   : > { %p755_p12 = pnand %p754_p4, %p748_p10 }
  0xc4   : > { %758 = shalt.err (!%p755_p12)
}
  0xc5   : > { %565 = dma.vmem_to_hbm [thread:$0]  (%p1276_p11), %s1186_s3, 128, %s1184_s29, %s417_s18  }
  0xc6 PF: > { %p579_p13 = scmp.ge.s32.totalorder %s857_s19, 2  ;;  %s442_s0 = sand.u32 1, %s817_s9  }
  0xc7   : > { %p1277_p2 = scmp.ne.s32.totalorder %s1268_s12, 0  ;;  %s443_s17 = scalar_lea.sflag [#allocation4], %s442_s0 }
  0xc9   : > { %p575_p3 = pnand %p579_p13, %p1277_p2 }
  0xcb   : > { %812 = dma.done.wait (!%p575_p3), %s443_s17, 128  }
  0xcc   : > { %814 = vsyncadd (!%p575_p3), %s443_s17, 4294967168  ;;  %s21_s19 = sadd.s32 1, %s857_s19   ;;  %s1278_s15 = sld [smem:[#allocation11_spill]] }
  0xcd   : > { %p18_p0 = scmp.ge.s32.totalorder %s21_s19, 6   ;;  %s1279_s16 = sld [smem:[#allocation12_spill]] }
  0xce   : > { %s1280_s17 = sld [smem:[#allocation13_spill]]  ;;  %s1281_s18 = sld [smem:[#allocation14_spill]] }
  0xcf   : > { %s1282_s9 = smov %s821_s10  ;;  %s1283_s10 = smov %s825_s11 }
  0xd0   : > { %s1284_s11 = smov %s970_s5  ;;  %s1285_s12 = smov %s833_s13 }
  0xd1   : > { %s1286_s13 = smov %s837_s14  ;;  %s1287_s14 = smov %s982_s7 }
  0xd2   :  { %20 = sbr.rel (!%p18_p0) target bundleno = 13 (0xd), region = 90 }
  0xd9   :  { %448 = vsyncpa [#allocation3], 1 }
  0xda   :  { %450 = vsyncpa [#allocation3 + $0x1], 1 }
  0xdb   :  { %451 = vsyncpa [#allocation6], 1 }
  0xdc   :  { %453 = vsyncpa [#allocation6 + $0x1], 1 }
  0xdd   :  { %454 = vsyncpa [#allocation4], 1 }
  0xde   :  { %456 = vsyncpa [#allocation4 + $0x1], 1 }

</bundles_post_ra>
